<compile_context>
chip_gen: v7x
topology: tpu7x:2x2x1
jax: 0.10.0
libtpu: 0.0.40
codegen_flags: <defaults>
</compile_context>

<pallas_src>
import functools

import numpy as np
import jax
import jax.numpy as jnp
from jax.experimental import pallas as pl
from jax.experimental.pallas import tpu as pltpu


# ----------------------------------------------------------------------
# Pallas kernel: one grid step = one batch.  One GEMM (conv over all taps and
# all output-freq rows) + folded-BN bias + ReLU + max-pool over freq.
# ----------------------------------------------------------------------
def _conv_v_kernel(cols_ref, w_ref, b_ref, o_ref, *, hout, wout):
    # (hout*wout, K) x (K, cout) — bf16 MXU operands, f32 accumulation.
    y = jnp.dot(cols_ref[0], w_ref[...], preferred_element_type=jnp.float32)
    # Folded-BN bias + ReLU (f32 VPU epilogue).
    y = jnp.maximum(y + b_ref[...], 0.0)
    # Max-pool over the hout frequency rows (static, sublane-aligned slices;
    # wout is a multiple of 8 here).
    mx = y[0:wout, :]
    for h in range(1, hout):
        mx = jnp.maximum(mx, y[h * wout:(h + 1) * wout, :])
    o_ref[0] = mx                      # (wout, cout) lane-dense store


# ----------------------------------------------------------------------
# Wrapper: parameter folding / layout prep (glue) + one pallas_call.
# ----------------------------------------------------------------------
def conv_v_forward(x, params):
    """Conv_V.forward. x: (B, Cin, H, W) f32 NCHW.  Returns (B, Cout, W')."""
    w, b = params["conv_w"], params["conv_b"]          # (Cout,Cin,fh,fw), (Cout,)
    bn = params["bn"]
    cout, cin, fh, fw = w.shape
    B, _, H, W = x.shape
    pw = fw // 2
    hout = H - fh + 1
    wp = W + 2 * pw
    wout = wp - fw + 1
    K = fh * fw * cin

    # Fold eval-mode BatchNorm2d into the conv weight / bias.
    scale = bn["gamma"] / jnp.sqrt(bn["var"] + 1e-5)
    wf = w * scale[:, None, None, None]
    bf = (b - bn["mean"]) * scale + bn["beta"]

    # (Cout,Cin,fh,fw) -> (K=fh*fw*cin, Cout); K ordered (dh, dw, c) to match
    # the im2col column order below.  bf16 MXU operand.
    wr = jnp.transpose(wf, (2, 3, 1, 0)).reshape(K, cout).astype(jnp.bfloat16)

    # TODO(synk): one-time layout plumbing stays host-side glue (bridges from
    # the PyTorch NCHW layout): NCHW->NHWC, time-axis padding, and the
    # lane-dense bf16 im2col operand (B, hout*wout, K) — no arithmetic here.
    xh = jnp.transpose(x, (0, 2, 3, 1))                            # (B,H,W,Cin)
    xh = jnp.pad(xh, ((0, 0), (0, 0), (pw, pw), (0, 0))).astype(jnp.bfloat16)
    cols = jnp.concatenate(
        [xh[:, dh:dh + hout, dw:dw + wout, :]
         for dh in range(fh) for dw in range(fw)], axis=-1)        # (B,hout,wout,K)
    cols = cols.reshape(B, hout * wout, K)

    # TODO(synk): at production CNN14 sizes (W ~ thousands of frames) tile Wout
    # (extra "parallel" grid axis, ~512-1024 rows per block) and budget VMEM
    # against v7x's 64 MiB; unnecessary at these small shapes.
    out = pl.pallas_call(
        functools.partial(_conv_v_kernel, hout=hout, wout=wout),
        out_shape=jax.ShapeDtypeStruct((B, wout, cout), jnp.float32),
        grid=(B,),
        in_specs=[
            # per-batch im2col slab (hout*wout, K)
            pl.BlockSpec((1, hout * wout, K), lambda b_: (b_, 0, 0)),
            # full folded weight (constant across the grid)
            pl.BlockSpec((K, cout), lambda b_: (0, 0)),
            # folded bias (constant)
            pl.BlockSpec((1, cout), lambda b_: (0, 0)),
        ],
        out_specs=pl.BlockSpec((1, wout, cout), lambda b_: (b_, 0, 0)),
        compiler_params=pltpu.CompilerParams(
            dimension_semantics=("parallel",)),        # v7x: both TCs busy
    )(cols, wr, bf.reshape(1, cout).astype(jnp.float32))

    # Match the PyTorch return layout (B, Cout, W'); tiny pooled-output transpose.
    return jnp.transpose(out, (0, 2, 1))


# ----------------------------------------------------------------------
# Plain-JAX reference (same math, un-fused) for a sanity check.
# ----------------------------------------------------------------------
def conv_v_reference(x, params):
    w, b = params["conv_w"], params["conv_b"]
    bn = params["bn"]
    fw = w.shape[-1]
    y = jax.lax.conv_general_dilated(
        x, w, window_strides=(1, 1),
        padding=((0, 0), (fw // 2, fw // 2)),
        dimension_numbers=("NCHW", "OIHW", "NCHW"),
        precision=jax.lax.Precision.HIGHEST)
    y = y + b[None, :, None, None]
    scale = bn["gamma"] / jnp.sqrt(bn["var"] + 1e-5)
    y = (y - bn["mean"][None, :, None, None]) * scale[None, :, None, None] \
        + bn["beta"][None, :, None, None]
    y = jnp.maximum(y, 0.0)
    return jnp.max(y, axis=2)                      # maxpool over freq + squeeze


if __name__ == "__main__":
    key = jax.random.PRNGKey(0)
    k1, k2, k3, k4, k5, k6 = jax.random.split(key, 6)

    # Small shapes consistent with the module: B=2, Cin=4, H=16 mel bins,
    # W=32 frames, vertical filter (8, 3), Cout=128 (lane-dense).
    B, Cin, H, W = 2, 4, 16, 32
    Cout, fh, fw = 128, 8, 3

    x = jax.random.normal(k1, (B, Cin, H, W), jnp.float32)
    params = {
        "conv_w": jax.random.normal(k2, (Cout, Cin, fh, fw), jnp.float32)
                  / np.sqrt(Cin * fh * fw),
        "conv_b": jax.random.normal(k3, (Cout,), jnp.float32) * 0.01,
        "bn": {
            "gamma": 1.0 + 0.1 * jax.random.normal(k4, (Cout,), jnp.float32),
            "beta": 0.1 * jax.random.normal(k5, (Cout,), jnp.float32),
            "mean": 0.1 * jax.random.normal(k6, (Cout,), jnp.float32),
            "var": jnp.ones((Cout,), jnp.float32),
        },
    }

    out = jax.jit(conv_v_forward)(x, params)
    jax.block_until_ready(out)

    wout = W + 2 * (fw // 2) - fw + 1
    assert out.shape == (B, Cout, wout)
    assert bool(jnp.all(jnp.isfinite(out)))

    ref = conv_v_reference(x, params)
    # bf16 MXU operands vs. f32 HIGHEST reference -> expect ~1e-2-level deltas.
    err = float(jnp.max(jnp.abs(out - ref)))
    assert err < 1e-1, f"max abs error vs reference too large: {err}"

    print("KERNEL_OK")
</pallas_src>

<mosaic_0001>
module attributes {stable_mosaic.version = 11 : i64} {
  func.func @_conv_v_kernel(%arg0: i32, %arg1: memref<1x288x96xbf16, #tpu.memory_space<vmem>>, %arg2: memref<96x128xbf16, #tpu.memory_space<vmem>>, %arg3: memref<1x128xf32, #tpu.memory_space<vmem>>, %arg4: memref<1x32x128xf32, #tpu.memory_space<vmem>>) attributes {dimension_semantics = [#tpu.dimension_semantics<parallel>], iteration_bounds = array<i64: 2>, scalar_prefetch = 0 : i64, scratch_operands = 0 : i64, tpu.core_type = #tpu.core_type<tc>, window_params = [{transform_indices = @transform_0, window_bounds = array<i64: 1, 288, 96>}, {pipeline_mode = #tpu.pipeline_mode<synchronous>, transform_indices = @transform_1, window_bounds = array<i64: 96, 128>}, {pipeline_mode = #tpu.pipeline_mode<synchronous>, transform_indices = @transform_2, window_bounds = array<i64: 1, 128>}, {transform_indices = @transform_3, window_bounds = array<i64: 1, 32, 128>}]} {
    %c0 = arith.constant 0 : index
    %c0_0 = arith.constant 0 : index
    %c0_1 = arith.constant 0 : index
    %0 = vector.load %arg1[%c0, %c0_0, %c0_1] : memref<1x288x96xbf16, #tpu.memory_space<vmem>>, vector<1x288x96xbf16>
    %1 = vector.shape_cast %0 : vector<1x288x96xbf16> to vector<288x96xbf16>
    %c0_2 = arith.constant 0 : index
    %c0_3 = arith.constant 0 : index
    %2 = vector.load %arg2[%c0_2, %c0_3] : memref<96x128xbf16, #tpu.memory_space<vmem>>, vector<96x128xbf16>
    %cst = arith.constant dense<0.000000e+00> : vector<288x128xf32>
    %3 = tpu.matmul %1, %2, %cst {dimension_numbers = #tpu.dot_dimension_numbers<[1], [0], [0], [1], [0, 0, 1, 1], [], []>} : vector<288x96xbf16>, vector<96x128xbf16>, vector<288x128xf32> -> vector<288x128xf32>
    %c0_4 = arith.constant 0 : index
    %c0_5 = arith.constant 0 : index
    %4 = vector.load %arg3[%c0_4, %c0_5] : memref<1x128xf32, #tpu.memory_space<vmem>>, vector<1x128xf32>
    %5 = vector.broadcast %4 : vector<1x128xf32> to vector<288x128xf32>
    %6 = arith.addf %3, %5 : vector<288x128xf32>
    %cst_6 = arith.constant 0.000000e+00 : f32
    %7 = vector.broadcast %cst_6 : f32 to vector<288x128xf32>
    %8 = arith.maximumf %6, %7 : vector<288x128xf32>
    %9 = vector.extract_strided_slice %8 {offsets = [0, 0], sizes = [32, 128], strides = [1, 1]} : vector<288x128xf32> to vector<32x128xf32>
    %10 = vector.extract_strided_slice %8 {offsets = [32, 0], sizes = [32, 128], strides = [1, 1]} : vector<288x128xf32> to vector<32x128xf32>
    %11 = arith.maximumf %9, %10 : vector<32x128xf32>
    %12 = vector.extract_strided_slice %8 {offsets = [64, 0], sizes = [32, 128], strides = [1, 1]} : vector<288x128xf32> to vector<32x128xf32>
    %13 = arith.maximumf %11, %12 : vector<32x128xf32>
    %14 = vector.extract_strided_slice %8 {offsets = [96, 0], sizes = [32, 128], strides = [1, 1]} : vector<288x128xf32> to vector<32x128xf32>
    %15 = arith.maximumf %13, %14 : vector<32x128xf32>
    %16 = vector.extract_strided_slice %8 {offsets = [128, 0], sizes = [32, 128], strides = [1, 1]} : vector<288x128xf32> to vector<32x128xf32>
    %17 = arith.maximumf %15, %16 : vector<32x128xf32>
    %18 = vector.extract_strided_slice %8 {offsets = [160, 0], sizes = [32, 128], strides = [1, 1]} : vector<288x128xf32> to vector<32x128xf32>
    %19 = arith.maximumf %17, %18 : vector<32x128xf32>
    %20 = vector.extract_strided_slice %8 {offsets = [192, 0], sizes = [32, 128], strides = [1, 1]} : vector<288x128xf32> to vector<32x128xf32>
    %21 = arith.maximumf %19, %20 : vector<32x128xf32>
    %22 = vector.extract_strided_slice %8 {offsets = [224, 0], sizes = [32, 128], strides = [1, 1]} : vector<288x128xf32> to vector<32x128xf32>
    %23 = arith.maximumf %21, %22 : vector<32x128xf32>
    %24 = vector.extract_strided_slice %8 {offsets = [256, 0], sizes = [32, 128], strides = [1, 1]} : vector<288x128xf32> to vector<32x128xf32>
    %25 = arith.maximumf %23, %24 : vector<32x128xf32>
    %c0_7 = arith.constant 0 : index
    %c0_8 = arith.constant 0 : index
    %c0_9 = arith.constant 0 : index
    %26 = vector.load %arg4[%c0_7, %c0_8, %c0_9] : memref<1x32x128xf32, #tpu.memory_space<vmem>>, vector<1x32x128xf32>
    %27 = vector.shape_cast %26 : vector<1x32x128xf32> to vector<32x128xf32>
    %28 = vector.shape_cast %25 : vector<32x128xf32> to vector<1x32x128xf32>
    tpu.vector_store %arg4[%c0_7, %c0_8, %c0_9], %28 {strides = array<i32>} : memref<1x32x128xf32, #tpu.memory_space<vmem>>, vector<1x32x128xf32>,
    return
  }
  func.func @transform_0(%arg0: i32) -> (i32, i32, i32) {
    %c0_i32 = arith.constant 0 : i32
    %c0_i32_0 = arith.constant 0 : i32
    %c0_i32_1 = arith.constant 0 : i32
    return %arg0, %c0_i32, %c0_i32_0 : i32, i32, i32
  }
  func.func @transform_1(%arg0: i32) -> (i32, i32) {
    %c0_i32 = arith.constant 0 : i32
    %c0_i32_0 = arith.constant 0 : i32
    %c0_i32_1 = arith.constant 0 : i32
    return %c0_i32, %c0_i32_0 : i32, i32
  }
  func.func @transform_2(%arg0: i32) -> (i32, i32) {
    %c0_i32 = arith.constant 0 : i32
    %c0_i32_0 = arith.constant 0 : i32
    %c0_i32_1 = arith.constant 0 : i32
    return %c0_i32, %c0_i32_0 : i32, i32
  }
  func.func @transform_3(%arg0: i32) -> (i32, i32, i32) {
    %c0_i32 = arith.constant 0 : i32
    %c0_i32_0 = arith.constant 0 : i32
    %c0_i32_1 = arith.constant 0 : i32
    return %arg0, %c0_i32, %c0_i32_0 : i32, i32, i32
  }
}

</mosaic_0001>

<bundles_post_ra>
// kernel: conv_v_forward.1
= control target key start
LH: loop header
LB: loop body
LE: loop exit
PB: predicated region body
PF: predicated region fallthrough
CT: control target
= control target key end

     0   :  { %8 = vsyncpa [#allocation3], 0  ;;  %s1257_s0 = inlined_call_operand.vmem [shape: bf16[2,288,96], index: 0, kind: input, shape index: {}]   ;;  %s1258_s1 = inlined_call_operand.vmem [shape: bf16[96,128], index: 1, kind: input, shape index: {}]   ;;  %s1259_s2 = inlined_call_operand.vmem [shape: f32[1,128], index: 2, kind: input, shape index: {}]   ;;  %s1260_s3 = inlined_call_operand.hbm [shape: f32[2,32,128], index: 3, kind: output, shape index: {}]  }
   0x1   :  { %10 = vsyncpa [#allocation3 + $0x1], 0  ;;  %s1023_s12 = smov 0   ;;  %s1025_s13 = smov 0  }
   0x2   :  { %s1027_s14 = smov 0   ;;  %s1029_s15 = smov 0  }
   0x3 LB: > { %s1044_s16 = sadd.s32 4294967295, %s998_s15   ;;  %s731_s17 = sadd.s32 4294967294, %s998_s15   ;;  %s998_s15 = sphi %s1029_s15, %s1266_s15   ;;  %s994_s14 = sphi %s1027_s14, %s1265_s14   ;;  %s990_s13 = sphi %s1025_s13, %s1264_s13   ;;  %s986_s12 = sphi %s1023_s12, %s1263_s12  }
   0x4   : > { %s1048_s18 = sadd.s32 1, %s998_s15   ;;  %s91_s19 = sadd.s32 1, %s994_s14 }
   0x5   : > { %s88_s20 = ssub.s32 %s998_s15, %s1048_s18  ;;  %p101_p0 = scmp.ne.s32.totalorder %s994_s14, %s990_s13 }
   0x6   : > { %p89_p1 = scmp.eq.s32.totalorder %s88_s20, 0  ;;  %p102_p2 = scmp.eq.s32.totalorder %s1044_s16, 1 }
   0x7   : > { %p107_p3 = scmp.ne.s32.totalorder %s990_s13, %s986_s12  ;;  %p108_p4 = scmp.eq.s32.totalorder %s731_s17, 1 }
   0x8   : > { %s1059_s21 = scalar_select %p89_p1, %s994_s14, %s91_s19  }
   0x9   : > { %p1061_p5 = por %p102_p2, %p101_p0  ;;  %p1065_p6 = por %p108_p4, %p107_p3 }
   0xa   : > { %p734_p7 = scmp.ge.s32.totalorder %s998_s15, 1  ;;  %p140_p8 = scmp.lt.s32.totalorder %s998_s15, 3 }
   0xc   : > { %p141_p9 = pnand %p734_p7, %p140_p8 }
   0xd   : > { %v912_v0 = vld [vmem:[%s1258_s1] sm:$0xff] (!%p141_p9)   ;;  %p164_p10 = scmp.lt.s32.totalorder (!%p141_p9), %s1044_s16, 1  ;;  %v913_v1 = vld [vmem:[%s1258_s1 + $0x8] sm:$0xff] (!%p141_p9)   ;;  %v914_v2 = vld [vmem:[%s1258_s1 + $0x10] sm:$0xff] (!%p141_p9)   ;;  %vm351_vm0 = vcmask (!%p141_p9), 785408   ;;  %s161_s25 = sand.u32 (!%p141_p9), 1, %s990_s13  }
   0xe   : > { %144 = sbr.rel (%p141_p9) target bundleno = 315 (0x13b), region = 32  ;;  %810 = vmatprep.subr.bf16.mxu0 (!%p141_p9), %v912_v0  ;;  %858 = vmatprep.subr.bf16.mxu1 (!%p141_p9), %v912_v0  ;;  %v915_v4 = vld [vmem:[%s1258_s1 + $0x18] sm:$0xff] (!%p141_p9)   ;;  %v916_v6 = vld [vmem:[%s1258_s1 + $0x20] sm:$0xff] (!%p141_p9)   ;;  %v917_v7 = vld [vmem:[%s1258_s1 + $0x28] sm:$0xff] (!%p141_p9)   ;;  %s735_s26 = sshll.u32 (!%p141_p9), %s161_s25, 5 }
   0xf   : > { %811 = vmatpush3.bf16.msra.mxu0 (!%p141_p9), %v912_v0  ;;  %864 = vmatpush3.bf16.msra.mxu1 (!%p141_p9), %v912_v0  ;;  %v1143_v32 = vld [vmem:[%s1259_s2] ss:$0 sm:$0xff] (!%p141_p9)  ;;  %s163_s27 = scalar_lea.vmem (!%p141_p9), [#allocation2], %s735_s26  ;;  %s785_s29 = sshll.u32 (!%p141_p9), %s1044_s16, 9 }
  0x10   : > { %812 = vmatprep.subr.bf16.mxu0 (!%p141_p9), %v913_v1  ;;  %859 = vmatprep.subr.bf16.mxu1 (!%p141_p9), %v913_v1  ;;  %s1212_s5 = scalar_lea.hbm (!%p141_p9), %s1260_s3, %s785_s29 }
  0x13   : > { %813 = vmatpush3.bf16.msra.mxu0 (!%p141_p9), %v913_v1  ;;  %865 = vmatpush3.bf16.msra.mxu1 (!%p141_p9), %v913_v1 }
  0x14   : > { %814 = vmatprep.subr.bf16.mxu0 (!%p141_p9), %v914_v2  ;;  %860 = vmatprep.subr.bf16.mxu1 (!%p141_p9), %v914_v2 }
  0x15   : > { %s165_s28 = scalar_select %p164_p10, %s1044_s16, 1 }
  0x16   : > { %s1216_s16 = scalar_lea.sflag [#allocation3], %s161_s25 }
  0x17   : > { %s870_s4 = smul.u32 144, %s165_s28  ;;  %815 = vmatpush3.bf16.msra.mxu0 %v914_v2  ;;  %866 = vmatpush3.bf16.msra.mxu1 %v914_v2  ;;  %s669_s28 = sshll.u32 %s163_s27, 4  ;;  %s1207_s28 = int_to_ptr.vmem [resolvable:$true] %s669_s28 }
  0x18   : > { %816 = vmatprep.subr.bf16.mxu0 %v915_v4  ;;  %861 = vmatprep.subr.bf16.mxu1 %v915_v4  ;;  %s936_s6 = scalar_lea.vmem %s1207_s28, 512 }
  0x19   : > { %s1085_s7 = scalar_lea.vmem %s1257_s0, %s870_s4  ;;  %p937_p11 = scmp.ne.s32.totalorder %s1207_s28, %s936_s6 }
  0x1a   : > { %v918_v3 = vld [vmem:[%s1085_s7] sm:$0xff]   ;;  %v922_v5 = vld [vmem:[%s1085_s7 + $0x50] sm:$0xff]   ;;  %v919_v8 = vld [vmem:[%s1085_s7 + $0x8] sm:$0xff]  }
  0x1b   : > { %822 = vmatprep.mubr.msk.bf16.mxu0 %vm351_vm0, %v918_v3  ;;  %842 = vmatprep.mubr.msk.bf16.mxu1 %vm351_vm0, %v922_v5  ;;  %v920_v9 = vld [vmem:[%s1085_s7 + $0x10] sm:$0xff]   ;;  %v923_v10 = vld [vmem:[%s1085_s7 + $0x58] sm:$0xff]   ;;  %v926_v11 = vld [vmem:[%s1085_s7 + $0x60] sm:$0xff]   ;;  %p938_p12 = pnand %p937_p11, %p1061_p5 }
  0x1c   : > { %817 = vmatpush3.bf16.msra.mxu0 %v915_v4  ;;  %867 = vmatpush3.bf16.msra.mxu1 %v915_v4  ;;  %v921_v12 = vld [vmem:[%s1085_s7 + $0x18] sm:$0xff]   ;;  %v927_v13 = vld [vmem:[%s1085_s7 + $0x68] sm:$0xff]   ;;  %v924_v14 = vld [vmem:[%s1085_s7 + $0x20] sm:$0xff]  }
  0x1d   : > { %818 = vmatprep.subr.bf16.mxu0 %v916_v6  ;;  %862 = vmatprep.subr.bf16.mxu1 %v916_v6  ;;  %v930_v15 = vld [vmem:[%s1085_s7 + $0x70] sm:$0xff]   ;;  %v925_v16 = vld [vmem:[%s1085_s7 + $0x28] sm:$0xff]   ;;  %v931_v17 = vld [vmem:[%s1085_s7 + $0x78] sm:$0xff]   ;;  %p939_p13 = pneg %p938_p12 }
  0x1e   : > { %v928_v18 = vld [vmem:[%s1085_s7 + $0x30] sm:$0xff]   ;;  %v934_v19 = vld [vmem:[%s1085_s7 + $0x80] sm:$0xff]   ;;  %v929_v20 = vld [vmem:[%s1085_s7 + $0x38] sm:$0xff]  }
  0x1f   : > { %v935_v21 = vld [vmem:[%s1085_s7 + $0x88] sm:$0xff]   ;;  %v932_v22 = vld [vmem:[%s1085_s7 + $0x40] sm:$0xff]  }
  0x20   : > { %819 = vmatpush3.bf16.msra.mxu0 %v916_v6  ;;  %868 = vmatpush3.bf16.msra.mxu1 %v916_v6  ;;  %v933_v23 = vld [vmem:[%s1085_s7 + $0x48] sm:$0xff]   ;;  %s1000_s7 = smov [#allocation2]  }
  0x21   : > { %820 = vmatprep.subr.bf16.mxu0 %v917_v7  ;;  %863 = vmatprep.subr.bf16.mxu1 %v917_v7  ;;  %s940_s8 = sshll.u32 %s1000_s7, 4  ;;  %s941_s8 = int_to_ptr.vmem [resolvable:$false] %s940_s8 }
  0x22   : > { %s942_s9 = scalar_lea.vmem %s941_s8, 1024  ;;  %p943_p0 = scmp.lt.s32.totalorder %s1207_s28, %s941_s8 }
  0x23   : > { %p944_p1 = scmp.lt.s32.totalorder %s942_s9, %s936_s6 }
  0x24   : > { %821 = vmatpush3.bf16.msra.mxu0 %v917_v7  ;;  %869 = vmatpush3.bf16.msra.mxu1 %v917_v7 }
  0x25   : > { %p945_p2 = por %p944_p1, %p943_p0 }
  0x27   : > { %823 = vmatmul.mubr.msk.bf16.vlgmr.msra.gmra.mrb[0].mxu0 %vm351_vm0, %v919_v8  ;;  %843 = vmatmul.mubr.msk.bf16.vlgmr.msra.gmra.mrb[0].mxu1 %vm351_vm0, %v923_v10  ;;  %p946_p3 = pnand %p945_p2, %p939_p13 }
  0x28   : > { %826 = vmatprep.mubr.msk.bf16.mxu0 %vm351_vm0, %v920_v9  ;;  %846 = vmatprep.mubr.msk.bf16.mxu1 %vm351_vm0, %v926_v11 }
  0x2f   : > { %827 = vmatmul.mubr.msk.bf16.gmra.mrb[4].mxu0 %vm351_vm0, %v921_v12  ;;  %847 = vmatmul.mubr.msk.bf16.gmra.mrb[4].mxu1 %vm351_vm0, %v927_v13 }
  0x30   : > { %830 = vmatprep.mubr.msk.bf16.mxu0 %vm351_vm0, %v924_v14  ;;  %850 = vmatprep.mubr.msk.bf16.mxu1 %vm351_vm0, %v930_v15 }
  0x37   : > { %831 = vmatmul.mubr.msk.bf16.gmra.mrb[8].mxu0 %vm351_vm0, %v925_v16  ;;  %851 = vmatmul.mubr.msk.bf16.gmra.mrb[8].mxu1 %vm351_vm0, %v931_v17 }
  0x38   : > { %834 = vmatprep.mubr.msk.bf16.mxu0 %vm351_vm0, %v928_v18  ;;  %854 = vmatprep.mubr.msk.bf16.mxu1 %vm351_vm0, %v934_v19 }
  0x3f   : > { %835 = vmatmul.mubr.msk.bf16.gmra.mrb[12].mxu0 %vm351_vm0, %v929_v20  ;;  %855 = vmatmul.mubr.msk.bf16.gmra.mrb[12].mxu1 %vm351_vm0, %v935_v21 }
  0x40   : > { %838 = vmatprep.mubr.msk.bf16.mxu0 %vm351_vm0, %v932_v22 }
  0x47   : > { %839 = vmatmul.mubr.msk.bf16.gmra.mrb[16].mxu0 %vm351_vm0, %v933_v23 }
  0xfa   : > { %v824_v24 = vpop.f32.mrb[0].mxu0  ;;  %v1132_v25 = vpop.f32.mrb[0].mxu1 }
  0xfb   : > { %v440_v26 = vpop.f32.mrb[1].mxu0  ;;  %v1134_v27 = vpop.f32.mrb[1].mxu1  ;;  %v449_v33 = vadd.f32 %v824_v24, %v1143_v32 }
  0xfc   : > { %v825_v28 = vpop.f32.mrb[2].mxu0  ;;  %v1136_v29 = vpop.f32.mrb[2].mxu1  ;;  %v441_v34 = vadd.f32 %v1143_v32, %v440_v26 }
  0xfd   : > { %v443_v30 = vpop.f32.mrb[3].mxu0  ;;  %v1138_v31 = vpop.f32.mrb[3].mxu1  ;;  %v452_v37 = vadd.f32 %v825_v28, %v1143_v32  ;;  %v585_v45 = vmax.f32 %v449_v33, 0.0 }
  0xfe   : > { %v444_v41 = vadd.f32 %v1143_v32, %v443_v30  ;;  %v583_v50 = vmax.f32 %v441_v34, 0.0 }
  0xff   : > { %v586_v53 = vmax.f32 %v452_v37, 0.0  ;;  %v529_v37 = vadd.f32 %v1132_v25, %v1143_v32 }
 0x100   : > { %v584_v56 = vmax.f32 %v444_v41, 0.0 }
 0x102   : > { %v828_v35 = vpop.f32.mrb[4].mxu0  ;;  %v1147_v36 = vpop.f32.mrb[4].mxu1 }
 0x103   : > { %v465_v38 = vadd.f32 %v828_v35, %v1143_v32  ;;  %v456_v39 = vpop.f32.mrb[5].mxu0  ;;  %v1151_v40 = vpop.f32.mrb[5].mxu1 }
 0x104   : > { %v457_v42 = vadd.f32 %v1143_v32, %v456_v39  ;;  %v829_v43 = vpop.f32.mrb[6].mxu0  ;;  %v1155_v44 = vpop.f32.mrb[6].mxu1  ;;  %v537_v25 = vadd.f32 %v1143_v32, %v1151_v40 }
 0x105   : > { %v589_v46 = vmax.f32 %v465_v38, 0.0  ;;  %v468_v47 = vadd.f32 %v829_v43, %v1143_v32  ;;  %v459_v48 = vpop.f32.mrb[7].mxu0  ;;  %v1158_v49 = vpop.f32.mrb[7].mxu1  ;;  %v521_v38 = vadd.f32 %v1143_v32, %v1134_v27  ;;  %v524_v43 = vadd.f32 %v1143_v32, %v1138_v31 }
 0x106   : > { %v587_v51 = vmax.f32 %v457_v42, 0.0  ;;  %v460_v52 = vadd.f32 %v1143_v32, %v459_v48  ;;  %v532_v42 = vadd.f32 %v1136_v29, %v1143_v32  ;;  %v605_v27 = vmax.f32 %v529_v37, 0.0 }
 0x107   : > { %v621_v54 = vmax.f32 %v585_v45, %v589_v46  ;;  %v590_v55 = vmax.f32 %v468_v47, 0.0  ;;  %v545_v47 = vadd.f32 %v1147_v36, %v1143_v32  ;;  %v540_v36 = vadd.f32 %v1143_v32, %v1158_v49 }
 0x108   : > { %v619_v57 = vmax.f32 %v583_v50, %v587_v51  ;;  %v588_v58 = vmax.f32 %v460_v52, 0.0  ;;  %v603_v52 = vmax.f32 %v521_v38, 0.0  ;;  %v606_v31 = vmax.f32 %v532_v42, 0.0 }
 0x109   : > { %v622_v59 = vmax.f32 %v586_v53, %v590_v55  ;;  %v548_v53 = vadd.f32 %v1155_v44, %v1143_v32  ;;  %v604_v55 = vmax.f32 %v524_v43, 0.0  ;;  %v609_v40 = vmax.f32 %v545_v47, 0.0 }
 0x10a   : > { %v620_v60 = vmax.f32 %v584_v56, %v588_v58  ;;  %v832_v61 = vpop.f32.mrb[8].mxu0  ;;  %v852_v62 = vpop.f32.mrb[8].mxu1  ;;  %v607_v44 = vmax.f32 %v537_v25, 0.0 }
 0x10b   : > { %v481_v63 = vadd.f32 %v832_v61, %v1143_v32  ;;  %v472_v0 = vpop.f32.mrb[9].mxu0  ;;  %v552_v1 = vpop.f32.mrb[9].mxu1  ;;  %v561_v58 = vadd.f32 %v852_v62, %v1143_v32 }
 0x10c   : > { %v473_v2 = vadd.f32 %v1143_v32, %v472_v0  ;;  %v833_v3 = vpop.f32.mrb[10].mxu0  ;;  %v1163_v4 = vpop.f32.mrb[10].mxu1 }
 0x10d   : > { %v593_v5 = vmax.f32 %v481_v63, 0.0  ;;  %v484_v6 = vadd.f32 %v833_v3, %v1143_v32  ;;  %v475_v7 = vpop.f32.mrb[11].mxu0  ;;  %v1166_v8 = vpop.f32.mrb[11].mxu1  ;;  %v553_v63 = vadd.f32 %v1143_v32, %v552_v1  ;;  %v610_v3 = vmax.f32 %v548_v53, 0.0 }
 0x10e   : > { %v591_v9 = vmax.f32 %v473_v2, 0.0  ;;  %v476_v10 = vadd.f32 %v1143_v32, %v475_v7  ;;  %v608_v7 = vmax.f32 %v540_v36, 0.0 }
 0x10f   : > { %v625_v11 = vmax.f32 %v621_v54, %v593_v5  ;;  %v594_v12 = vmax.f32 %v484_v6, 0.0 }
 0x110   : > { %v623_v13 = vmax.f32 %v619_v57, %v591_v9  ;;  %v592_v14 = vmax.f32 %v476_v10, 0.0 }
 0x111   : > { %v626_v15 = vmax.f32 %v622_v59, %v594_v12  ;;  %v564_v12 = vadd.f32 %v1163_v4, %v1143_v32 }
 0x112   : > { %v624_v16 = vmax.f32 %v620_v60, %v592_v14  ;;  %v836_v17 = vpop.f32.mrb[12].mxu0  ;;  %v856_v18 = vpop.f32.mrb[12].mxu1  ;;  %v611_v14 = vmax.f32 %v553_v63, 0.0 }
 0x113   : > { %v497_v19 = vadd.f32 %v836_v17, %v1143_v32  ;;  %v488_v20 = vpop.f32.mrb[13].mxu0  ;;  %v568_v21 = vpop.f32.mrb[13].mxu1  ;;  %v577_v6 = vadd.f32 %v856_v18, %v1143_v32 }
 0x114   : > { %v489_v22 = vadd.f32 %v1143_v32, %v488_v20  ;;  %v837_v23 = vpop.f32.mrb[14].mxu0  ;;  %v857_v24 = vpop.f32.mrb[14].mxu1  ;;  %v569_v10 = vadd.f32 %v1143_v32, %v568_v21 }
 0x115   : > { %v597_v26 = vmax.f32 %v497_v19, 0.0  ;;  %v500_v28 = vadd.f32 %v837_v23, %v1143_v32  ;;  %v491_v30 = vpop.f32.mrb[15].mxu0  ;;  %v571_v33 = vpop.f32.mrb[15].mxu1  ;;  %v617_v19 = vmax.f32 %v577_v6, 0.0  ;;  %v580_v21 = vadd.f32 %v857_v24, %v1143_v32 }
 0x116   : > { %v595_v34 = vmax.f32 %v489_v22, 0.0  ;;  %v492_v35 = vadd.f32 %v1143_v32, %v491_v30  ;;  %v615_v23 = vmax.f32 %v569_v10, 0.0  ;;  %v572_v4 = vadd.f32 %v1143_v32, %v571_v33 }
 0x117   : > { %v629_v39 = vmax.f32 %v625_v11, %v597_v26  ;;  %v598_v41 = vmax.f32 %v500_v28, 0.0  ;;  %v613_v11 = vmax.f32 %v561_v58, 0.0  ;;  %v614_v28 = vmax.f32 %v564_v12, 0.0 }
 0x118   : > { %v627_v45 = vmax.f32 %v623_v13, %v595_v34  ;;  %v596_v46 = vmax.f32 %v492_v35, 0.0  ;;  %v616_v42 = vmax.f32 %v572_v4, 0.0 }
 0x119   : > { %v630_v48 = vmax.f32 %v626_v15, %v598_v41  ;;  %v556_v15 = vadd.f32 %v1143_v32, %v1166_v8 }
 0x11a   : > { %v628_v50 = vmax.f32 %v624_v16, %v596_v46  ;;  %v840_v51 = vpop.f32.mrb[16].mxu0 }
 0x11b   : > { %v513_v29 = vadd.f32 %v840_v51, %v1143_v32  ;;  %v504_v54 = vpop.f32.mrb[17].mxu0  ;;  %v612_v35 = vmax.f32 %v556_v15, 0.0 }
 0x11c   : > { %v505_v56 = vadd.f32 %v1143_v32, %v504_v54  ;;  %v841_v57 = vpop.f32.mrb[18].mxu0 }
 0x11d   : > { %v601_v59 = vmax.f32 %v513_v29, 0.0  ;;  %v516_v60 = vadd.f32 %v841_v57, %v1143_v32  ;;  %v507_v61 = vpop.f32.mrb[19].mxu0 }
 0x11e   : > { %v599_v0 = vmax.f32 %v505_v56, 0.0  ;;  %v508_v2 = vadd.f32 %v1143_v32, %v507_v61 }
 0x11f   : > { %v633_v5 = vmax.f32 %v629_v39, %v601_v59  ;;  %v602_v49 = vmax.f32 %v516_v60, 0.0  ;;  %v618_v39 = vmax.f32 %v580_v21, 0.0 }
 0x120   : > { %v631_v9 = vmax.f32 %v627_v45, %v599_v0  ;;  %v600_v62 = vmax.f32 %v508_v2, 0.0 }
 0x121   : > { %v637_v1 = vmax.f32 %v633_v5, %v605_v27  ;;  %v634_v13 = vmax.f32 %v630_v48, %v602_v49 }
 0x122   : > { %v635_v16 = vmax.f32 %v631_v9, %v603_v52  ;;  %v632_v17 = vmax.f32 %v628_v50, %v600_v62 }
 0x123   : > { %v638_v18 = vmax.f32 %v634_v13, %v606_v31  ;;  %v641_v20 = vmax.f32 %v637_v1, %v609_v40 }
 0x124   : > { %v636_v22 = vmax.f32 %v632_v17, %v604_v55  ;;  %v639_v26 = vmax.f32 %v635_v16, %v607_v44 }
 0x125   : > { %v645_v30 = vmax.f32 %v641_v20, %v613_v11  ;;  %v642_v34 = vmax.f32 %v638_v18, %v610_v3 }
 0x126   : > { %v643_v8 = vmax.f32 %v639_v26, %v611_v14  ;;  %v640_v37 = vmax.f32 %v636_v22, %v608_v7 }
 0x127   : > { %v649_v38 = vmax.f32 %v645_v30, %v617_v19  ;;  %v646_v41 = vmax.f32 %v642_v34, %v614_v28 }
 0x128   : > { %v647_v24 = vmax.f32 %v643_v8, %v615_v23  ;;  %v644_v43 = vmax.f32 %v640_v37, %v612_v35 }
 0x129   : > { %653 = vst [vmem:[%s163_s27 + $0x10] sm:$0xff] %v649_v38  ;;  %v650_v32 = vmax.f32 %v646_v41, %v618_v39 }
 0x12a   : > { %651 = vst [vmem:[%s163_s27] sm:$0xff] %v647_v24  ;;  %v648_v33 = vmax.f32 %v644_v43, %v616_v42 }
 0x12b   : > { %654 = vst [vmem:[%s163_s27 + $0x18] sm:$0xff] %v650_v32 }
 0x12c   : > { %652 = vst [vmem:[%s163_s27 + $0x8] sm:$0xff] %v648_v33 }
 0x12d   : > { %949 = shalt.err (!%p946_p3)
}
 0x12e   : > { %s950_s10 = scalar_lea.hbm %s1212_s5, 512  ;;  %s954_s19 = scalar_lea.hbm %s1260_s3, 1024 }
 0x12f   : > { %p951_p4 = scmp.ne.s32.totalorder %s1212_s5, %s950_s10  ;;  %p955_p9 = scmp.lt.u32.totalorder %s1212_s5, %s1260_s3 }
 0x130   : > { %p956_p10 = scmp.lt.u32.totalorder %s954_s19, %s950_s10  ;;  %p958_p12 = scmp.lt.u32.totalorder %s950_s10, %s1212_s5 }
 0x131   : > { %p952_p7 = pnand %p951_p4, %p1061_p5 }
 0x132   : > { %p957_p11 = por %p956_p10, %p955_p9 }
 0x133   : > { %p953_p8 = pneg %p952_p7 }
 0x134   : > { %p959_p13 = por %p958_p12, %p957_p11 }
 0x136   : > { %p960_p0 = pnand %p959_p13, %p953_p8 }
 0x138   : > { %963 = shalt.err (!%p960_p0)
}
 0x139   : > { %s1001_s25 = smov 128   ;;  %s1002_s26 = smov 8  }
 0x13a   : > { %871 = dma.vmem_to_hbm [thread:$0]  (%p1061_p5), %s1207_s28, 512, %s1212_s5, %s1216_s16, %s1001_s25, %s1001_s25, %s1002_s26  }
 0x13b PF: > { %p877_p1 = scmp.ge.s32.totalorder %s998_s15, 2  ;;  %s684_s27 = sand.u32 1, %s986_s12  }
 0x13c   : > { %s685_s29 = scalar_lea.sflag [#allocation3], %s684_s27 }
 0x13d   : > { %p874_p2 = pnand %p877_p1, %p1065_p6 }
 0x13f   : > { %981 = dma.done.wait (!%p874_p2), %s685_s29, 512  }
 0x140   : > { %983 = vsyncadd (!%p874_p2), %s685_s29, 4294966784  ;;  %p13_p3 = scmp.ge.s32.totalorder %s1048_s18, 4   ;;  %s1263_s12 = smov %s990_s13 }
 0x141   : > { %s1264_s13 = smov %s994_s14  ;;  %s1265_s14 = smov %s1059_s21 }
 0x142   : > { %s1266_s15 = smov %s1048_s18  ;;  %15 = sbr.rel (!%p13_p3) target bundleno = 3 (0x3), region = 67 }
 0x149   :  { %690 = vsyncpa [#allocation3], 1 }
 0x14a   :  { %692 = vsyncpa [#allocation3 + $0x1], 1 }

</bundles_post_ra>
